<compile_context>
chip_gen: v6e
topology: v6e:2x2x1
jax: 0.10.0
libtpu: 0.0.40
codegen_flags: <defaults>
</compile_context>

<pallas_src>
import jax
import jax.numpy as jnp
from jax.experimental import pallas as pl
from jax.experimental.pallas import tpu as pltpu


def _round_up(x, m):
    return (x + m - 1) // m * m


def _vmem_capacity_bytes():
    try:
        return int(pltpu.get_tpu_info().vmem_capacity_bytes)
    except Exception:
        return 128 << 20  # safe default (v5e/v6e)


def _default_tm_cap():
    try:
        kind = jax.devices()[0].device_kind.lower()
    except Exception:
        kind = ""
    # v6e needs ~650 flops/byte to stay MXU-bound when streaming weights, so a
    # larger row tile helps there; v5e is already compute-bound at 256-512 and
    # v7x is VMEM-constrained (fit loop below shrinks further if needed).
    if "v6" in kind:
        return 1024
    return 512


def _largest_div_tile(dim, cap):
    """Largest multiple of 128 that divides `dim` (a multiple of 128), <= cap."""
    t = max(128, min(cap, dim) // 128 * 128)
    while dim % t:
        t -= 128
    return t


def _ffn_kernel(x_ref, w1_ref, b1_ref, w2_ref, b2_ref, o_ref):
    # x_ref : (tm, Ep) bf16    w1_ref: (Ep, th) bf16    b1_ref: (1, th) f32
    # w2_ref: (th, Ep) bf16    b2_ref: (1, Ep) f32      o_ref : (tm, Ep) f32
    # o_ref is resident across the k (hidden-dim reduction) axis and doubles
    # as the f32 accumulator.
    k = pl.program_id(1)

    @pl.when(k == 0)
    def _():
        o_ref[...] = jnp.zeros_like(o_ref)

    # First matmul: bf16 operands, f32 MXU accumulation; bias + ReLU in f32.
    h = jnp.dot(x_ref[...], w1_ref[...], preferred_element_type=jnp.float32)
    h = jnp.maximum(h + b1_ref[...], 0.0)

    # TODO(synk): dropout omitted (identity, eval mode); training-mode dropout
    # would use pltpu.prng_seed + pltpu.stateful_bernoulli on `h` here.

    # Second matmul: partial contribution of this H-slice, accumulated in f32
    # directly into the resident output block.
    o_ref[...] += jnp.dot(h.astype(jnp.bfloat16), w2_ref[...],
                          preferred_element_type=jnp.float32)

    @pl.when(k == pl.num_programs(1) - 1)
    def _():
        # b2 is added exactly once, in the finalize step.
        o_ref[...] += b2_ref[...]


def prepare_params(w1, b1, w2, b2):
    """One-time weight prep: cast to bf16 and zero-pad feature dims to 128.

    Padding is exact: padded x columns hit zero w1 rows; padded hidden units
    get b1 = 0 -> relu(0) = 0 -> multiplied by zero w2 rows.
    """
    E, H = w1.shape
    Ep, Hp = _round_up(E, 128), _round_up(H, 128)
    w1p = jnp.pad(w1.astype(jnp.bfloat16), ((0, Ep - E), (0, Hp - H)))
    b1p = jnp.pad(b1.astype(jnp.float32).reshape(1, H), ((0, 0), (0, Hp - H)))
    w2p = jnp.pad(w2.astype(jnp.bfloat16), ((0, Hp - H), (0, Ep - E)))
    b2p = jnp.pad(b2.astype(jnp.float32).reshape(1, E), ((0, 0), (0, Ep - E)))
    return w1p, b1p, w2p, b2p


def positionwise_feed_forward(x, w1p, b1p, w2p, b2p, *, tm=None, th=None):
    """x: [B, S, E]; w1p: [Ep, Hp] bf16; b1p: [1, Hp] f32; w2p: [Hp, Ep] bf16;
    b2p: [1, Ep] f32 (from prepare_params)  ->  [B, S, E] in x.dtype."""
    B, S, E = x.shape
    Ep, Hp = w1p.shape
    assert Ep == _round_up(E, 128) and w2p.shape == (Hp, Ep)
    M = B * S

    # --- tile selection sized against actual VMEM capacity -------------------
    if tm is None:
        tm = min(_default_tm_cap(), _round_up(M, 128))
    tm = max(8, _round_up(tm, 8))
    if th is None:
        th = 512
    th = _largest_div_tile(Hp, th)

    def footprint(tm_, th_):
        return (2 * tm_ * Ep * 2          # x bf16 double buffer
                + 2 * tm_ * Ep * 4        # out f32 double buffer (accumulator)
                + 2 * Ep * th_ * 2        # w1 bf16 double buffer
                + 2 * th_ * Ep * 2        # w2 bf16 double buffer
                + 2 * 8 * th_ * 4         # b1 (sublane-padded)
                + 2 * 8 * Ep * 4          # b2 (sublane-padded)
                + tm_ * th_ * 4)          # live (tm, th) intermediate h

    vmem_cap = _vmem_capacity_bytes()
    budget = int(vmem_cap * 0.6)
    while footprint(tm, th) > budget and tm > 128:
        tm = max(128, tm - 128)
    while footprint(tm, th) > budget and th > 128:
        th = _largest_div_tile(Hp, th - 128)

    Mp = _round_up(M, tm)
    grid = (Mp // tm, Hp // th)

    # Lane-dense, bf16 input tile (cast folded into the pad, done once here).
    x2d = jnp.pad(x.reshape(M, E).astype(jnp.bfloat16),
                  ((0, Mp - M), (0, Ep - E)))

    fp = footprint(tm, th)
    vmem_limit = min(max(int(fp * 1.4) + (4 << 20), 32 << 20),
                     int(vmem_cap * 0.9))

    m_tiles = Mp // tm
    cost = pl.CostEstimate(
        flops=4 * Mp * Ep * Hp,                       # two matmuls, 2*M*E*H each
        transcendentals=0,
        bytes_accessed=(Mp * Ep * 2                   # x in (bf16)
                        + Mp * Ep * 4                 # y out (f32)
                        + m_tiles * (2 * Ep * Hp * 2  # weights re-streamed per M tile
                                     + (Hp + Ep) * 4)),  # biases per M tile
    )

    out2d = pl.pallas_call(
        _ffn_kernel,
        out_shape=jax.ShapeDtypeStruct((Mp, Ep), jnp.float32),
        grid_spec=pltpu.PrefetchScalarGridSpec(
            num_scalar_prefetch=0,
            grid=grid,
            in_specs=[
                pl.BlockSpec((tm, Ep), lambda i, k: (i, 0)),   # x row tile
                pl.BlockSpec((Ep, th), lambda i, k: (0, k)),   # w1 H-slice
                pl.BlockSpec((1, th), lambda i, k: (0, k)),    # b1 H-slice
                pl.BlockSpec((th, Ep), lambda i, k: (k, 0)),   # w2 H-slice
                pl.BlockSpec((1, Ep), lambda i, k: (0, 0)),    # b2 (constant)
            ],
            out_specs=pl.BlockSpec((tm, Ep), lambda i, k: (i, 0)),
        ),
        compiler_params=pltpu.CompilerParams(
            dimension_semantics=("parallel", "arbitrary"),
            vmem_limit_bytes=vmem_limit,
        ),
        cost_estimate=cost,
    )(x2d, w1p, b1p, w2p, b2p)

    return out2d[:M, :E].reshape(B, S, E).astype(x.dtype)


def init_params(key, embedding_dim, hidden):
    """Deterministic init mimicking nn.Linear (uniform +-1/sqrt(fan_in)).

    Weights are stored pre-transposed relative to PyTorch's [out, in] layout:
      w1: [E, H], b1: [H], w2: [H, E], b2: [E].
    """
    k1, k2, k3, k4 = jax.random.split(key, 4)
    bound1 = 1.0 / jnp.sqrt(embedding_dim)
    bound2 = 1.0 / jnp.sqrt(hidden)
    w1 = jax.random.uniform(k1, (embedding_dim, hidden), jnp.float32, -bound1, bound1)
    b1 = jax.random.uniform(k2, (hidden,), jnp.float32, -bound1, bound1)
    w2 = jax.random.uniform(k3, (hidden, embedding_dim), jnp.float32, -bound2, bound2)
    b2 = jax.random.uniform(k4, (embedding_dim,), jnp.float32, -bound2, bound2)
    return w1, b1, w2, b2


def _reference(x, w1, b1, w2, b2):
    """Pure-JAX reference emulating the kernel's bf16-operand / f32-accum math."""
    h = jnp.dot(x.astype(jnp.bfloat16), w1.astype(jnp.bfloat16),
                preferred_element_type=jnp.float32) + b1
    h = jnp.maximum(h, 0.0)
    return jnp.dot(h.astype(jnp.bfloat16), w2.astype(jnp.bfloat16),
                   preferred_element_type=jnp.float32) + b2


if __name__ == "__main__":
    # --- small shapes consistent with the module ------------------------------
    B, S, E, H = 2, 8, 32, 64
    key = jax.random.PRNGKey(0)
    kx, kp = jax.random.split(key)
    x = jax.random.normal(kx, (B, S, E), jnp.float32)
    w1, b1, w2, b2 = init_params(kp, E, H)
    prepared = prepare_params(w1, b1, w2, b2)   # hoisted out of the hot path

    out = jax.block_until_ready(positionwise_feed_forward(x, *prepared))
    ref = _reference(x, w1, b1, w2, b2)
    assert out.shape == (B, S, E)
    assert jnp.allclose(out, ref, atol=1e-2, rtol=1e-2), \
        float(jnp.max(jnp.abs(out - ref)))

    # --- second config exercising multiple M tiles and H-reduction steps ------
    B2, S2, E2, H2 = 2, 256, 128, 1024
    kx2, kp2 = jax.random.split(jax.random.PRNGKey(1))
    x2 = jax.random.normal(kx2, (B2, S2, E2), jnp.float32)
    p2_raw = init_params(kp2, E2, H2)
    p2 = prepare_params(*p2_raw)
    out2 = jax.block_until_ready(
        positionwise_feed_forward(x2, *p2, tm=256, th=512))
    ref2 = _reference(x2, *p2_raw)
    assert out2.shape == (B2, S2, E2)
    assert jnp.allclose(out2, ref2, atol=1e-2, rtol=1e-2), \
        float(jnp.max(jnp.abs(out2 - ref2)))

    print("KERNEL_OK")
</pallas_src>

<mosaic_0001>
module attributes {stable_mosaic.version = 11 : i64} {
  func.func @_ffn_kernel(%arg0: i32, %arg1: i32, %arg2: memref<128x128xbf16, #tpu.memory_space<vmem>>, %arg3: memref<128x128xbf16, #tpu.memory_space<vmem>>, %arg4: memref<1x128xf32, #tpu.memory_space<vmem>>, %arg5: memref<128x128xbf16, #tpu.memory_space<vmem>>, %arg6: memref<1x128xf32, #tpu.memory_space<vmem>>, %arg7: memref<128x128xf32, #tpu.memory_space<vmem>>) attributes {dimension_semantics = [#tpu.dimension_semantics<parallel>, #tpu.dimension_semantics<arbitrary>], iteration_bounds = array<i64: 1, 1>, scalar_prefetch = 0 : i64, scratch_operands = 0 : i64, tpu.core_type = #tpu.core_type<tc>, window_params = [{transform_indices = @transform_0, window_bounds = array<i64: 128, 128>}, {transform_indices = @transform_1, window_bounds = array<i64: 128, 128>}, {transform_indices = @transform_2, window_bounds = array<i64: 1, 128>}, {transform_indices = @transform_3, window_bounds = array<i64: 128, 128>}, {pipeline_mode = #tpu.pipeline_mode<synchronous>, transform_indices = @transform_4, window_bounds = array<i64: 1, 128>}, {transform_indices = @transform_5, window_bounds = array<i64: 128, 128>}]} {
    %c0_i32 = arith.constant 0 : i32
    %0 = arith.cmpi eq, %arg1, %c0_i32 : i32
    %1 = arith.extui %0 : i1 to i32
    %c0_i32_0 = arith.constant 0 : i32
    %2 = arith.cmpi ne, %1, %c0_i32_0 : i32
    scf.if %2 {
      %cst_16 = arith.constant 0.000000e+00 : f32
      %20 = vector.broadcast %cst_16 : f32 to vector<128x128xf32>
      %c0_17 = arith.constant 0 : index
      %c0_18 = arith.constant 0 : index
      %21 = vector.load %arg7[%c0_17, %c0_18] : memref<128x128xf32, #tpu.memory_space<vmem>>, vector<128x128xf32>
      tpu.vector_store %arg7[%c0_17, %c0_18], %20 {strides = array<i32>} : memref<128x128xf32, #tpu.memory_space<vmem>>, vector<128x128xf32>,
    } else {
    }
    %c0 = arith.constant 0 : index
    %c0_1 = arith.constant 0 : index
    %3 = vector.load %arg2[%c0, %c0_1] : memref<128x128xbf16, #tpu.memory_space<vmem>>, vector<128x128xbf16>
    %c0_2 = arith.constant 0 : index
    %c0_3 = arith.constant 0 : index
    %4 = vector.load %arg3[%c0_2, %c0_3] : memref<128x128xbf16, #tpu.memory_space<vmem>>, vector<128x128xbf16>
    %cst = arith.constant dense<0.000000e+00> : vector<128x128xf32>
    %5 = tpu.matmul %3, %4, %cst {dimension_numbers = #tpu.dot_dimension_numbers<[1], [0], [0], [1], [0, 0, 1, 1], [], []>} : vector<128x128xbf16>, vector<128x128xbf16>, vector<128x128xf32> -> vector<128x128xf32>
    %c0_4 = arith.constant 0 : index
    %c0_5 = arith.constant 0 : index
    %6 = vector.load %arg4[%c0_4, %c0_5] : memref<1x128xf32, #tpu.memory_space<vmem>>, vector<1x128xf32>
    %7 = vector.broadcast %6 : vector<1x128xf32> to vector<128x128xf32>
    %8 = arith.addf %5, %7 : vector<128x128xf32>
    %cst_6 = arith.constant 0.000000e+00 : f32
    %9 = vector.broadcast %cst_6 : f32 to vector<128x128xf32>
    %10 = arith.maximumf %8, %9 : vector<128x128xf32>
    %c0_7 = arith.constant 0 : index
    %c0_8 = arith.constant 0 : index
    %11 = vector.load %arg7[%c0_7, %c0_8] : memref<128x128xf32, #tpu.memory_space<vmem>>, vector<128x128xf32>
    %12 = arith.truncf %10 : vector<128x128xf32> to vector<128x128xbf16>
    %c0_9 = arith.constant 0 : index
    %c0_10 = arith.constant 0 : index
    %13 = vector.load %arg5[%c0_9, %c0_10] : memref<128x128xbf16, #tpu.memory_space<vmem>>, vector<128x128xbf16>
    %cst_11 = arith.constant dense<0.000000e+00> : vector<128x128xf32>
    %14 = tpu.matmul %12, %13, %cst_11 {dimension_numbers = #tpu.dot_dimension_numbers<[1], [0], [0], [1], [0, 0, 1, 1], [], []>} : vector<128x128xbf16>, vector<128x128xbf16>, vector<128x128xf32> -> vector<128x128xf32>
    %15 = arith.addf %11, %14 : vector<128x128xf32>
    %c0_12 = arith.constant 0 : index
    %c0_13 = arith.constant 0 : index
    %16 = vector.load %arg7[%c0_12, %c0_13] : memref<128x128xf32, #tpu.memory_space<vmem>>, vector<128x128xf32>
    tpu.vector_store %arg7[%c0_12, %c0_13], %15 {strides = array<i32>} : memref<128x128xf32, #tpu.memory_space<vmem>>, vector<128x128xf32>,
    %c0_i32_14 = arith.constant 0 : i32
    %17 = arith.cmpi eq, %arg1, %c0_i32_14 : i32
    %18 = arith.extui %17 : i1 to i32
    %c0_i32_15 = arith.constant 0 : i32
    %19 = arith.cmpi ne, %18, %c0_i32_15 : i32
    scf.if %19 {
      %c0_16 = arith.constant 0 : index
      %c0_17 = arith.constant 0 : index
      %20 = vector.load %arg7[%c0_16, %c0_17] : memref<128x128xf32, #tpu.memory_space<vmem>>, vector<128x128xf32>
      %c0_18 = arith.constant 0 : index
      %c0_19 = arith.constant 0 : index
      %21 = vector.load %arg6[%c0_18, %c0_19] : memref<1x128xf32, #tpu.memory_space<vmem>>, vector<1x128xf32>
      %22 = vector.broadcast %21 : vector<1x128xf32> to vector<128x128xf32>
      %23 = arith.addf %20, %22 : vector<128x128xf32>
      %c0_20 = arith.constant 0 : index
      %c0_21 = arith.constant 0 : index
      %24 = vector.load %arg7[%c0_20, %c0_21] : memref<128x128xf32, #tpu.memory_space<vmem>>, vector<128x128xf32>
      tpu.vector_store %arg7[%c0_20, %c0_21], %23 {strides = array<i32>} : memref<128x128xf32, #tpu.memory_space<vmem>>, vector<128x128xf32>,
    } else {
    }
    return
  }
  func.func @transform_0(%arg0: i32, %arg1: i32) -> (i32, i32) {
    %c0_i32 = arith.constant 0 : i32
    %c0_i32_0 = arith.constant 0 : i32
    return %arg0, %c0_i32 : i32, i32
  }
  func.func @transform_1(%arg0: i32, %arg1: i32) -> (i32, i32) {
    %c0_i32 = arith.constant 0 : i32
    %c0_i32_0 = arith.constant 0 : i32
    return %c0_i32, %arg1 : i32, i32
  }
  func.func @transform_2(%arg0: i32, %arg1: i32) -> (i32, i32) {
    %c0_i32 = arith.constant 0 : i32
    %c0_i32_0 = arith.constant 0 : i32
    return %c0_i32, %arg1 : i32, i32
  }
  func.func @transform_3(%arg0: i32, %arg1: i32) -> (i32, i32) {
    %c0_i32 = arith.constant 0 : i32
    %c0_i32_0 = arith.constant 0 : i32
    return %arg1, %c0_i32 : i32, i32
  }
  func.func @transform_4(%arg0: i32, %arg1: i32) -> (i32, i32) {
    %c0_i32 = arith.constant 0 : i32
    %c0_i32_0 = arith.constant 0 : i32
    %c0_i32_1 = arith.constant 0 : i32
    return %c0_i32, %c0_i32_0 : i32, i32
  }
  func.func @transform_5(%arg0: i32, %arg1: i32) -> (i32, i32) {
    %c0_i32 = arith.constant 0 : i32
    %c0_i32_0 = arith.constant 0 : i32
    return %arg0, %c0_i32 : i32, i32
  }
}

</mosaic_0001>

<bundles_post_ra>
// kernel: tpu_custom_call.1
= control target key start
LH: loop header
LB: loop body
LE: loop exit
PB: predicated region body
PF: predicated region fallthrough
CT: control target
= control target key end

     0   :  { %10 = vsyncpa [#allocation3], 0  ;;  %s921_s0 = inlined_call_operand.hbm [shape: bf16[128,128], index: 0, kind: input, shape index: {}]   ;;  %s922_s1 = inlined_call_operand.hbm [shape: bf16[128,128], index: 1, kind: input, shape index: {}]   ;;  %s923_s2 = inlined_call_operand.vmem [shape: f32[1,128], index: 2, kind: input, shape index: {}]   ;;  %s924_s3 = inlined_call_operand.hbm [shape: bf16[128,128], index: 3, kind: input, shape index: {}]   ;;  %s925_s4 = inlined_call_operand.vmem [shape: f32[1,128], index: 4, kind: input, shape index: {}]   ;;  %s926_s5 = inlined_call_operand.hbm [shape: f32[128,128], index: 5, kind: output, shape index: {}]  }
   0x1   :  { %11 = vsyncpa [#allocation6], 0 }
   0x2   :  { %12 = vsyncpa [#allocation4], 0  ;;  %s865_s18 = smov [#allocation5]   ;;  %s866_s20 = smov [#allocation2]  }
   0x3   :  { %s30_s19 = sshll.u32 %s865_s18, 4  ;;  %s18_s21 = sshll.u32 %s866_s20, 4  ;;  %s31_s19 = int_to_ptr.vmem [resolvable:$true] %s30_s19  ;;  %s19_s21 = int_to_ptr.vmem [resolvable:$true] %s18_s21 }
   0x4   :  { %s787_s22 = scalar_lea.vmem %s31_s19, 1024  ;;  %p792_p1 = scmp.lt.s32.totalorder %s31_s19, %s31_s19 }
   0x5   :  { %p788_p0 = scmp.ne.s32.totalorder %s31_s19, %s787_s22  ;;  %p793_p2 = scmp.lt.s32.totalorder %s787_s22, %s787_s22 }
   0x7   :  { %p794_p3 = por %p793_p2, %p792_p1 }
   0x9   :  { %p795_p4 = pnand %p794_p3, %p788_p0 }
   0xb   :  { %798 = shalt.err (!%p795_p4)
}
   0xc   :  { %s867_s23 = smov 64   ;;  %s868_s24 = smov 4  }
   0xd   :  { %36 = dma.hbm_to_vmem [thread:$0]  %s922_s1, 1024, %s31_s19, [#allocation6], %s867_s23, %s867_s23, %s868_s24  }
   0xe   :  { %s807_s27 = scalar_lea.vmem %s19_s21, 1024  ;;  %p812_p6 = scmp.lt.s32.totalorder %s19_s21, %s19_s21 }
   0xf   :  { %p808_p5 = scmp.ne.s32.totalorder %s19_s21, %s807_s27  ;;  %p813_p7 = scmp.lt.s32.totalorder %s807_s27, %s807_s27 }
  0x11   :  { %p814_p8 = por %p813_p7, %p812_p6 }
  0x13   :  { %p815_p9 = pnand %p814_p8, %p808_p5 }
  0x15   :  { %818 = shalt.err (!%p815_p9)
}
  0x16   :  { %24 = dma.hbm_to_vmem [thread:$0]  %s921_s0, 1024, %s19_s21, [#allocation3], %s867_s23, %s867_s23, %s868_s24  }
  0x17   :  { %s869_s30 = smov [#allocation7]  }
  0x18   :  { %s44_s6 = sshll.u32 %s869_s30, 4  ;;  %s45_s6 = int_to_ptr.vmem [resolvable:$true] %s44_s6 }
  0x19   :  { %s827_s7 = scalar_lea.vmem %s45_s6, 1024  ;;  %p832_p11 = scmp.lt.s32.totalorder %s45_s6, %s45_s6 }
  0x1a   :  { %p828_p10 = scmp.ne.s32.totalorder %s45_s6, %s827_s7  ;;  %p833_p12 = scmp.lt.s32.totalorder %s827_s7, %s827_s7 }
  0x1c   :  { %p834_p13 = por %p833_p12, %p832_p11 }
  0x1e   :  { %p835_p0 = pnand %p834_p13, %p828_p10 }
  0x20   :  { %838 = shalt.err (!%p835_p0)
}
  0x21   :  { %50 = dma.hbm_to_vmem [thread:$0]  %s924_s3, 1024, %s45_s6, [#allocation6], %s867_s23, %s867_s23, %s868_s24  }
  0x22   :  { %859 = dma.done.wait [#allocation3], 1024  }
  0x23   :  { %860 = vsyncadd [#allocation3], 4294966272 }
  0x24   :  { %861 = dma.done.wait [#allocation6], 2048  }
  0x25   :  { %862 = vsyncadd [#allocation6], 4294965248  ;;  %v755_v0 = vld [vmem:[#allocation5 + $0x38] sm:$0xff]   ;;  %v756_v1 = vld [vmem:[#allocation5 + $0x30] sm:$0xff]  }
  0x26   :  { %682 = vmatprep.subr.bf16.mxu0 %v755_v0  ;;  %v757_v2 = vld [vmem:[#allocation5 + $0x28] sm:$0xff]   ;;  %v758_v3 = vld [vmem:[#allocation5 + $0x20] sm:$0xff]   ;;  %v759_v5 = vld [vmem:[#allocation5 + $0x18] sm:$0xff]  }
  0x27   :  { %683 = vmatpush3.bf16.msra.mxu0 %v755_v0  ;;  %v763_v4 = vld [vmem:[#allocation2] sm:$0xff]   ;;  %v760_v6 = vld [vmem:[#allocation5 + $0x10] sm:$0xff]   ;;  %v771_v7 = vld [vmem:[#allocation7 + $0x38] sm:$0xff]  }
  0x28   :  { %684 = vmatprep.subr.bf16.mxu0 %v756_v1  ;;  %698 = vmatprep.mubr.bf16.mxu0 %v763_v4  ;;  %v772_v8 = vld [vmem:[#allocation7 + $0x30] sm:$0xff]   ;;  %v761_v9 = vld [vmem:[#allocation5 + $0x8] sm:$0xff]   ;;  %v762_v11 = vld [vmem:[#allocation5] sm:$0xff]  }
  0x29   :  { %714 = vmatprep.subr.bf16.mxu1 %v771_v7  ;;  %v773_v10 = vld [vmem:[#allocation7 + $0x28] sm:$0xff]   ;;  %v774_v12 = vld [vmem:[#allocation7 + $0x20] sm:$0xff]   ;;  %v775_v13 = vld [vmem:[#allocation7 + $0x18] sm:$0xff]  }
  0x2a   :  { %715 = vmatpush3.bf16.msra.mxu1 %v771_v7  ;;  %v764_v14 = vld [vmem:[#allocation2 + $0x8] sm:$0xff]   ;;  %v765_v15 = vld [vmem:[#allocation2 + $0x10] sm:$0xff]   ;;  %v766_v16 = vld [vmem:[#allocation2 + $0x18] sm:$0xff]  }
  0x2b   :  { %685 = vmatpush3.bf16.msra.mxu0 %v756_v1  ;;  %716 = vmatprep.subr.bf16.mxu1 %v772_v8  ;;  %v767_v17 = vld [vmem:[#allocation2 + $0x20] sm:$0xff]   ;;  %v768_v18 = vld [vmem:[#allocation2 + $0x28] sm:$0xff]   ;;  %v769_v19 = vld [vmem:[#allocation2 + $0x30] sm:$0xff]  }
  0x2c   :  { %686 = vmatprep.subr.bf16.mxu0 %v757_v2  ;;  %v770_v20 = vld [vmem:[#allocation2 + $0x38] sm:$0xff]   ;;  %v776_v21 = vld [vmem:[#allocation7 + $0x10] sm:$0xff]   ;;  %v777_v22 = vld [vmem:[#allocation7 + $0x8] sm:$0xff]  }
  0x2d   :  { %v778_v23 = vld [vmem:[#allocation7] sm:$0xff]  }
  0x2e   :  { %717 = vmatpush3.bf16.msra.mxu1 %v772_v8  ;;  %v624_v26 = vld [vmem:[%s923_s2] ss:$0 sm:$0xff] }
  0x2f   :  { %687 = vmatpush3.bf16.msra.mxu0 %v757_v2  ;;  %718 = vmatprep.subr.bf16.mxu1 %v773_v10 }
  0x30   :  { %688 = vmatprep.subr.bf16.mxu0 %v758_v3 }
  0x32   :  { %719 = vmatpush3.bf16.msra.mxu1 %v773_v10 }
  0x33   :  { %689 = vmatpush3.bf16.msra.mxu0 %v758_v3  ;;  %720 = vmatprep.subr.bf16.mxu1 %v774_v12 }
  0x34   :  { %690 = vmatprep.subr.bf16.mxu0 %v759_v5 }
  0x36   :  { %721 = vmatpush3.bf16.msra.mxu1 %v774_v12 }
  0x37   :  { %691 = vmatpush3.bf16.msra.mxu0 %v759_v5  ;;  %722 = vmatprep.subr.bf16.mxu1 %v775_v13 }
  0x38   :  { %692 = vmatprep.subr.bf16.mxu0 %v760_v6 }
  0x3a   :  { %723 = vmatpush3.bf16.msra.mxu1 %v775_v13 }
  0x3b   :  { %693 = vmatpush3.bf16.msra.mxu0 %v760_v6  ;;  %724 = vmatprep.subr.bf16.mxu1 %v776_v21 }
  0x3c   :  { %694 = vmatprep.subr.bf16.mxu0 %v761_v9 }
  0x3e   :  { %725 = vmatpush3.bf16.msra.mxu1 %v776_v21 }
  0x3f   :  { %695 = vmatpush3.bf16.msra.mxu0 %v761_v9  ;;  %726 = vmatprep.subr.bf16.mxu1 %v777_v22 }
  0x40   :  { %696 = vmatprep.subr.bf16.mxu0 %v762_v11 }
  0x42   :  { %727 = vmatpush3.bf16.msra.mxu1 %v777_v22 }
  0x43   :  { %697 = vmatpush3.bf16.msra.mxu0 %v762_v11  ;;  %728 = vmatprep.subr.bf16.mxu1 %v778_v23 }
  0x46   :  { %699 = vmatmul.mubr.bf16.vlgmr.msra.gmra.mxu0 %v764_v14  ;;  %729 = vmatpush3.bf16.msra.mxu1 %v778_v23 }
  0x47   :  { %702 = vmatprep.mubr.bf16.mxu0 %v765_v15 }
  0x4e   :  { %703 = vmatmul.mubr.bf16.gmra.mxu0 %v766_v16 }
  0x4f   :  { %706 = vmatprep.mubr.bf16.mxu0 %v767_v17 }
  0x56   :  { %707 = vmatmul.mubr.bf16.gmra.mxu0 %v768_v18  ;;  %v649_v18 = vld [vmem:[%s925_s4] ss:$0 sm:$0xff]  ;;  %s870_s4 = smov [#allocation8]  }
  0x57   :  { %710 = vmatprep.mubr.bf16.mxu0 %v769_v19  ;;  %s611_s10 = sshll.u32 %s870_s4, 4  ;;  %s612_s10 = int_to_ptr.vmem [resolvable:$true] %s611_s10 }
  0x58   :  { %s839_s11 = scalar_lea.vmem %s612_s10, 2048  ;;  %p844_p2 = scmp.lt.s32.totalorder %s612_s10, %s612_s10 }
  0x59   :  { %p840_p1 = scmp.ne.s32.totalorder %s612_s10, %s839_s11  ;;  %p845_p3 = scmp.lt.s32.totalorder %s839_s11, %s839_s11 }
  0x5b   :  { %p846_p4 = por %p845_p3, %p844_p2 }
  0x5d   :  { %p847_p5 = pnand %p846_p4, %p840_p1 }
  0x5e   :  { %711 = vmatmul.mubr.bf16.gmra.mxu0 %v770_v20 }
 0x106   :  { %v700_v24 = vpop.f32.mrf.mxu0 }
 0x107   :  { %v261_v30 = vadd.f32 %v700_v24, %v624_v26 }
 0x108   :  { %v252_v25 = vpop.f32.mrf.mxu0 }
 0x109   :  { %v253_v28 = vadd.f32 %v624_v26, %v252_v25  ;;  %v317_v37 = vmax.f32 %v261_v30, 0.0 }
 0x10a   :  { %v701_v27 = vpop.f32.mrf.mxu0 }
 0x10b   :  { %v264_v29 = vadd.f32 %v701_v27, %v624_v26  ;;  %v315_v35 = vmax.f32 %v253_v28, 0.0 }
 0x10c   :  { %v255_v31 = vpop.f32.mrf.mxu0 }
 0x10d   :  { %v256_v32 = vadd.f32 %v624_v26, %v255_v31  ;;  %v318_v33 = vmax.f32 %v264_v29, 0.0 }
 0x10e   :  { %v704_v34 = vpop.f32.mrf.mxu0 }
 0x10f   :  { %v316_v36 = vmax.f32 %v256_v32, 0.0  ;;  %v348_v40 = vpack.c.bf16 %v318_v33, %v317_v37  ;;  %v277_v44 = vadd.f32 %v704_v34, %v624_v26 }
 0x110   :  { %v268_v38 = vpop.f32.mrf.mxu0 }
 0x111   :  { %v347_v39 = vpack.c.bf16 %v316_v36, %v315_v35  ;;  %v269_v42 = vadd.f32 %v624_v26, %v268_v38  ;;  %v321_v51 = vmax.f32 %v277_v44, 0.0 }
 0x112   :  { %v705_v41 = vpop.f32.mrf.mxu0 }
 0x113   :  { %v280_v43 = vadd.f32 %v705_v41, %v624_v26  ;;  %730 = vmatprep.mubr.bf16.mxu1 %v347_v39  ;;  %v319_v49 = vmax.f32 %v269_v42, 0.0 }
 0x114   :  { %v271_v45 = vpop.f32.mrf.mxu0  ;;  %731 = vmatmul.mubr.bf16.vlgmr.msra.gmra.mxu1 %v348_v40 }
 0x115   :  { %v272_v46 = vadd.f32 %v624_v26, %v271_v45  ;;  %v322_v47 = vmax.f32 %v280_v43, 0.0 }
 0x116   :  { %v708_v48 = vpop.f32.mrf.mxu0 }
 0x117   :  { %v320_v50 = vmax.f32 %v272_v46, 0.0  ;;  %v350_v54 = vpack.c.bf16 %v322_v47, %v321_v51  ;;  %v293_v58 = vadd.f32 %v708_v48, %v624_v26 }
 0x118   :  { %v284_v52 = vpop.f32.mrf.mxu0 }
 0x119   :  { %v349_v53 = vpack.c.bf16 %v320_v50, %v319_v49  ;;  %v285_v56 = vadd.f32 %v624_v26, %v284_v52  ;;  %v325_v1 = vmax.f32 %v293_v58, 0.0 }
 0x11a   :  { %v709_v55 = vpop.f32.mrf.mxu0 }
 0x11b   :  { %v296_v57 = vadd.f32 %v709_v55, %v624_v26  ;;  %734 = vmatprep.mubr.bf16.mxu1 %v349_v53  ;;  %v323_v63 = vmax.f32 %v285_v56, 0.0 }
 0x11c   :  { %v287_v59 = vpop.f32.mrf.mxu0  ;;  %735 = vmatmul.mubr.bf16.gmra.mxu1 %v350_v54 }
 0x11d   :  { %v288_v60 = vadd.f32 %v624_v26, %v287_v59  ;;  %v326_v61 = vmax.f32 %v296_v57, 0.0 }
 0x11e   :  { %v712_v62 = vpop.f32.mrf.mxu0 }
 0x11f   :  { %v324_v0 = vmax.f32 %v288_v60, 0.0  ;;  %v352_v4 = vpack.c.bf16 %v326_v61, %v325_v1  ;;  %v309_v8 = vadd.f32 %v712_v62, %v624_v26 }
 0x120   :  { %v300_v2 = vpop.f32.mrf.mxu0 }
 0x121   :  { %v351_v3 = vpack.c.bf16 %v324_v0, %v323_v63  ;;  %v301_v6 = vadd.f32 %v624_v26, %v300_v2  ;;  %v329_v14 = vmax.f32 %v309_v8, 0.0 }
 0x122   :  { %v713_v5 = vpop.f32.mrf.mxu0 }
 0x123   :  { %v312_v7 = vadd.f32 %v713_v5, %v624_v26  ;;  %738 = vmatprep.mubr.bf16.mxu1 %v351_v3  ;;  %v327_v12 = vmax.f32 %v301_v6, 0.0 }
 0x124   :  { %v303_v9 = vpop.f32.mrf.mxu0  ;;  %739 = vmatmul.mubr.bf16.gmra.mxu1 %v352_v4 }
 0x125   :  { %v304_v10 = vadd.f32 %v624_v26, %v303_v9  ;;  %v330_v11 = vmax.f32 %v312_v7, 0.0 }
 0x127   :  { %v328_v13 = vmax.f32 %v304_v10, 0.0  ;;  %v354_v16 = vpack.c.bf16 %v330_v11, %v329_v14 }
 0x129   :  { %v353_v15 = vpack.c.bf16 %v328_v13, %v327_v12 }
 0x12b   :  { %742 = vmatprep.mubr.bf16.mxu1 %v353_v15 }
 0x12c   :  { %743 = vmatmul.mubr.bf16.gmra.mxu1 %v354_v16 }
 0x1d4   :  { %v732_v17 = vpop.f32.mrf.mxu1 }
 0x1d5   :  { %v576_v20 = vadd.f32 %v732_v17, %v649_v18 }
 0x1d6   :  { %v453_v19 = vpop.f32.mrf.mxu1 }
 0x1d7   :  { %592 = vst [vmem:[#allocation8 + $0x10] sm:$0xff] %v576_v20  ;;  %v574_v22 = vadd.f32 %v649_v18, %v453_v19 }
 0x1d8   :  { %v733_v21 = vpop.f32.mrf.mxu1 }
 0x1d9   :  { %590 = vst [vmem:[#allocation8] sm:$0xff] %v574_v22  ;;  %v577_v24 = vadd.f32 %v733_v21, %v649_v18 }
 0x1da   :  { %v456_v23 = vpop.f32.mrf.mxu1 }
 0x1db   :  { %593 = vst [vmem:[#allocation8 + $0x18] sm:$0xff] %v577_v24  ;;  %v575_v26 = vadd.f32 %v649_v18, %v456_v23 }
 0x1dc   :  { %v736_v25 = vpop.f32.mrf.mxu1 }
 0x1dd   :  { %591 = vst [vmem:[#allocation8 + $0x8] sm:$0xff] %v575_v26  ;;  %v580_v28 = vadd.f32 %v736_v25, %v649_v18 }
 0x1de   :  { %v469_v27 = vpop.f32.mrf.mxu1 }
 0x1df   :  { %596 = vst [vmem:[#allocation8 + $0x30] sm:$0xff] %v580_v28  ;;  %v578_v30 = vadd.f32 %v649_v18, %v469_v27 }
 0x1e0   :  { %v737_v29 = vpop.f32.mrf.mxu1 }
 0x1e1   :  { %594 = vst [vmem:[#allocation8 + $0x20] sm:$0xff] %v578_v30  ;;  %v581_v32 = vadd.f32 %v737_v29, %v649_v18 }
 0x1e2   :  { %v472_v31 = vpop.f32.mrf.mxu1 }
 0x1e3   :  { %597 = vst [vmem:[#allocation8 + $0x38] sm:$0xff] %v581_v32  ;;  %v579_v34 = vadd.f32 %v649_v18, %v472_v31 }
 0x1e4   :  { %v740_v33 = vpop.f32.mrf.mxu1 }
 0x1e5   :  { %595 = vst [vmem:[#allocation8 + $0x28] sm:$0xff] %v579_v34  ;;  %v584_v36 = vadd.f32 %v740_v33, %v649_v18 }
 0x1e6   :  { %v485_v35 = vpop.f32.mrf.mxu1 }
 0x1e7   :  { %600 = vst [vmem:[#allocation8 + $0x50] sm:$0xff] %v584_v36  ;;  %v582_v38 = vadd.f32 %v649_v18, %v485_v35 }
 0x1e8   :  { %v741_v37 = vpop.f32.mrf.mxu1 }
 0x1e9   :  { %598 = vst [vmem:[#allocation8 + $0x40] sm:$0xff] %v582_v38  ;;  %v585_v40 = vadd.f32 %v741_v37, %v649_v18 }
 0x1ea   :  { %v488_v39 = vpop.f32.mrf.mxu1 }
 0x1eb   :  { %601 = vst [vmem:[#allocation8 + $0x58] sm:$0xff] %v585_v40  ;;  %v583_v42 = vadd.f32 %v649_v18, %v488_v39 }
 0x1ec   :  { %v744_v41 = vpop.f32.mrf.mxu1 }
 0x1ed   :  { %599 = vst [vmem:[#allocation8 + $0x48] sm:$0xff] %v583_v42  ;;  %v588_v44 = vadd.f32 %v744_v41, %v649_v18 }
 0x1ee   :  { %v501_v43 = vpop.f32.mrf.mxu1 }
 0x1ef   :  { %604 = vst [vmem:[#allocation8 + $0x70] sm:$0xff] %v588_v44  ;;  %v586_v46 = vadd.f32 %v649_v18, %v501_v43 }
 0x1f0   :  { %v745_v45 = vpop.f32.mrf.mxu1 }
 0x1f1   :  { %602 = vst [vmem:[#allocation8 + $0x60] sm:$0xff] %v586_v46  ;;  %v589_v48 = vadd.f32 %v745_v45, %v649_v18 }
 0x1f2   :  { %v504_v47 = vpop.f32.mrf.mxu1 }
 0x1f3   :  { %605 = vst [vmem:[#allocation8 + $0x78] sm:$0xff] %v589_v48  ;;  %v587_v49 = vadd.f32 %v649_v18, %v504_v47 }
 0x1f5   :  { %603 = vst [vmem:[#allocation8 + $0x68] sm:$0xff] %v587_v49 }
 0x1f6   :  { %850 = shalt.err (!%p847_p5)
}
 0x1f7   :  { %s871_s12 = smov 128   ;;  %s872_s13 = smov 8  }
 0x1f8   :  { %617 = dma.vmem_to_hbm [thread:$0]  %s612_s10, 2048, %s926_s5, [#allocation4], %s871_s12, %s871_s12, %s872_s13  }
 0x1f9   :  { %863 = dma.done.wait [#allocation4], 2048  }
 0x1fa   :  { %864 = vsyncadd [#allocation4], 4294965248 }
 0x1fb   :  { %621 = vsyncpa [#allocation3], 1 }
 0x1fc   :  { %622 = vsyncpa [#allocation6], 1 }
 0x1fd   :  { %623 = vsyncpa [#allocation4], 1 }

</bundles_post_ra>
